<compile_context>
chip_gen: v7x
topology: tpu7x:2x2x1
jax: 0.10.0
libtpu: 0.0.40
codegen_flags: <defaults>
</compile_context>

<pallas_src>
import jax
import jax.numpy as jnp
from jax import lax
from jax.experimental import pallas as pl
from jax.experimental.pallas import tpu as pltpu


def _round_up(x, m):
    return (x + m - 1) // m * m


# ---------------------------------------------------------------------------
# Kernels
# ---------------------------------------------------------------------------

def _gemm_bias_single_k_kernel(w_ref, p_ref, bias_ref, o_ref):
    """out tile = W (Cout_pad, K_pad) @ P (K_pad, tn) + bias; single resident K block."""
    acc = jnp.dot(w_ref[...], p_ref[...], preferred_element_type=jnp.float32)
    o_ref[...] = (acc + bias_ref[...]).astype(o_ref.dtype)


def _gemm_bias_multi_k_kernel(w_ref, p_ref, bias_ref, o_ref, acc_ref):
    """K is the innermost ("arbitrary") grid axis; bias is folded into the acc init."""
    @pl.when(pl.program_id(1) == 0)
    def _init():
        acc_ref[...] = jnp.broadcast_to(bias_ref[...], acc_ref.shape)

    acc_ref[...] += jnp.dot(w_ref[...], p_ref[...],
                            preferred_element_type=jnp.float32)

    @pl.when(pl.program_id(1) == pl.num_programs(1) - 1)
    def _finalize():
        o_ref[...] = acc_ref[...].astype(o_ref.dtype)


# ---------------------------------------------------------------------------
# Tiling / pallas_call wrapper
# ---------------------------------------------------------------------------

_VMEM_BLOCK_BUDGET = 12 * 1024 * 1024   # double-buffered patches-block budget (bytes)
_K_SINGLE_MAX = 4096                    # largest K kept as a single resident block
_TK_MULTI = 2048                        # K tile when a K grid axis is needed


def _choose_tiles(m, k_pad16):
    """Pick (tn, m_pad, tk, k_pad) for the flipped (Cout, K) x (K, M) GEMM."""
    single_k = k_pad16 <= _K_SINGLE_MAX
    tk = k_pad16 if single_k else _TK_MULTI
    k_pad = k_pad16 if single_k else _round_up(k_pad16, _TK_MULTI)

    m128 = _round_up(m, 128)
    tn = 128
    for cand in (1024, 512, 256):
        waste_ok = _round_up(m128, cand) - m128 <= m128 // 4
        vmem_ok = 2 * tk * cand * 2 <= _VMEM_BLOCK_BUDGET   # bf16, double-buffered
        if waste_ok and vmem_ok:
            tn = cand
            break
    # Keep >= 2 parallel grid blocks when possible (both TensorCores on v7x).
    while tn > 128 and _round_up(m128, tn) // tn < 2:
        tn //= 2
    m_pad = _round_up(m128, tn)
    return tn, m_pad, tk, k_pad


def _gemm_bias_t(w_mat, patches_t, bias_col, tn, tk, out_dtype=jnp.float32):
    """w_mat: (Cout_pad, K_pad) bf16, patches_t: (K_pad, M_pad) bf16,
    bias_col: (Cout_pad, 1) f32  ->  (Cout_pad, M_pad) out_dtype."""
    cout_pad, k_pad = w_mat.shape
    _, m_pad = patches_t.shape
    n_m_blocks = m_pad // tn
    single_k = (tk == k_pad)

    # Explicit VMEM budget (double-buffered operands + output + acc), generous margin.
    a_bytes = cout_pad * (k_pad if single_k else tk) * 2
    p_bytes = tk * tn * 2
    o_bytes = cout_pad * tn * 4
    bias_bytes = cout_pad * 4
    acc_bytes = 0 if single_k else cout_pad * tn * 4
    est = 2 * (a_bytes + p_bytes + o_bytes + bias_bytes) + acc_bytes
    vmem_limit = int(min(max(2 * est, 16 * 1024 * 1024), 48 * 1024 * 1024))

    cost = pl.CostEstimate(
        flops=2 * m_pad * k_pad * cout_pad,
        transcendentals=0,
        bytes_accessed=(w_mat.size * 2 + patches_t.size * 2
                        + bias_col.size * 4 + cout_pad * m_pad * 4),
    )
    out_shape = jax.ShapeDtypeStruct((cout_pad, m_pad), out_dtype)

    if single_k:
        return pl.pallas_call(
            _gemm_bias_single_k_kernel,
            out_shape=out_shape,
            grid=(n_m_blocks,),
            in_specs=[
                pl.BlockSpec((cout_pad, k_pad), lambda i: (0, 0)),   # resident weight
                pl.BlockSpec((k_pad, tn), lambda i: (0, i)),         # streamed patches
                pl.BlockSpec((cout_pad, 1), lambda i: (0, 0)),       # resident bias
            ],
            out_specs=pl.BlockSpec((cout_pad, tn), lambda i: (0, i)),
            compiler_params=pltpu.CompilerParams(
                dimension_semantics=("parallel",),
                vmem_limit_bytes=vmem_limit),
            cost_estimate=cost,
        )(w_mat, patches_t, bias_col)

    n_k_blocks = k_pad // tk
    return pl.pallas_call(
        _gemm_bias_multi_k_kernel,
        out_shape=out_shape,
        grid=(n_m_blocks, n_k_blocks),
        in_specs=[
            pl.BlockSpec((cout_pad, tk), lambda i, k: (0, k)),
            pl.BlockSpec((tk, tn), lambda i, k: (k, i)),
            pl.BlockSpec((cout_pad, 1), lambda i, k: (0, 0)),
        ],
        out_specs=pl.BlockSpec((cout_pad, tn), lambda i, k: (0, i)),
        scratch_shapes=[pltpu.VMEM((cout_pad, tn), jnp.float32)],
        compiler_params=pltpu.CompilerParams(
            dimension_semantics=("parallel", "arbitrary"),
            vmem_limit_bytes=vmem_limit),
        cost_estimate=cost,
    )(w_mat, patches_t, bias_col)


# ---------------------------------------------------------------------------
# DownSample3D forward
# ---------------------------------------------------------------------------

def downsample3d(x_ncdhw, weight, bias, *, stride=2, padding=0):
    """Pallas equivalent of DownSample3D.forward (Conv3d, stride, zero pad, + bias)."""
    N, Cin, D, H, W = x_ncdhw.shape
    Cout, Cin_w, KD, KH, KW = weight.shape
    assert Cin == Cin_w

    # ---- layout plumbing (XLA wrapper): (Cin, N, D, H, W) in bf16, zero pad ----
    xb = jnp.transpose(x_ncdhw, (1, 0, 2, 3, 4)).astype(jnp.bfloat16)
    if padding:
        p = padding
        xb = jnp.pad(xb, ((0, 0), (0, 0), (p, p), (p, p), (p, p)))
    Dp, Hp, Wp = xb.shape[2:]
    Dout = (Dp - KD) // stride + 1
    Hout = (Hp - KH) // stride + 1
    Wout = (Wp - KW) // stride + 1

    # transposed im2col: B = (K, M), K = (tap, Cin), M = (N, Dout, Hout, Wout)
    taps = []
    for zd in range(KD):
        for zh in range(KH):
            for zw in range(KW):
                taps.append(lax.slice(
                    xb,
                    (0, 0, zd, zh, zw),
                    (Cin, N,
                     zd + stride * (Dout - 1) + 1,
                     zh + stride * (Hout - 1) + 1,
                     zw + stride * (Wout - 1) + 1),
                    (1, 1, stride, stride, stride)))
    M = N * Dout * Hout * Wout
    K = KD * KH * KW * Cin
    patches_t = jnp.stack(taps, axis=0).reshape(K, M)         # (K, M), bf16

    k_pad16 = _round_up(K, 16)                                 # bf16 sublane granule
    tn, m_pad, tk, k_pad = _choose_tiles(M, k_pad16)
    cout_pad = _round_up(Cout, 16)

    patches_t = jnp.pad(patches_t, ((0, k_pad - K), (0, m_pad - M)))

    # weight OIDHW -> (Cout, KD, KH, KW, Cin) -> (Cout, K): same (tap, Cin) order as B rows
    w_mat = jnp.transpose(weight, (0, 2, 3, 4, 1)).reshape(Cout, K).astype(jnp.bfloat16)
    w_mat = jnp.pad(w_mat, ((0, cout_pad - Cout), (0, k_pad - K)))
    bias_col = jnp.pad(bias.astype(jnp.float32).reshape(Cout, 1),
                       ((0, cout_pad - Cout), (0, 0)))

    out_t = _gemm_bias_t(w_mat, patches_t, bias_col, tn, tk)   # (Cout_pad, M_pad) f32

    out = out_t[:Cout, :M].reshape(Cout, N, Dout, Hout, Wout)
    return jnp.transpose(out, (1, 0, 2, 3, 4))                 # -> NCDHW


if __name__ == "__main__":
    key = jax.random.PRNGKey(0)
    k1, k2, k3 = jax.random.split(key, 3)

    N, Cin, Cout = 2, 4, 8
    D = H = W = 17
    Ksz, stride, padding = 3, 2, 0

    x = jax.random.normal(k1, (N, Cin, D, H, W), jnp.float32)

    # deterministic Conv3d-style init (uniform in +/- 1/sqrt(fan_in))
    fan_in = Cin * Ksz * Ksz * Ksz
    bound = (1.0 / fan_in) ** 0.5
    weight = jax.random.uniform(k2, (Cout, Cin, Ksz, Ksz, Ksz), jnp.float32, -bound, bound)
    bias = jax.random.uniform(k3, (Cout,), jnp.float32, -bound, bound)

    y = jax.block_until_ready(
        downsample3d(x, weight, bias, stride=stride, padding=padding))

    # reference: XLA conv on the same bf16-rounded operands (f32 accumulate)
    xq = x.astype(jnp.bfloat16).astype(jnp.float32)
    wq = weight.astype(jnp.bfloat16).astype(jnp.float32)
    y_ref = lax.conv_general_dilated(
        xq, wq,
        window_strides=(stride, stride, stride),
        padding=[(padding, padding)] * 3,
        dimension_numbers=("NCDHW", "OIDHW", "NCDHW"),
        precision=lax.Precision.HIGHEST,
    ) + bias.reshape(1, Cout, 1, 1, 1)

    assert y.shape == y_ref.shape, (y.shape, y_ref.shape)
    err = float(jnp.max(jnp.abs(y - y_ref)))
    if err > 2e-3:
        raise AssertionError(f"kernel/reference mismatch, max abs err = {err}")
    print("KERNEL_OK")
</pallas_src>

<mosaic_0001>
module attributes {stable_mosaic.version = 11 : i64} {
  func.func @_gemm_bias_single_k_kernel(%arg0: i32, %arg1: memref<16x112xbf16, #tpu.memory_space<vmem>>, %arg2: memref<112x512xbf16, #tpu.memory_space<vmem>>, %arg3: memref<16x1xf32, #tpu.memory_space<vmem>>, %arg4: memref<16x512xf32, #tpu.memory_space<vmem>>) attributes {dimension_semantics = [#tpu.dimension_semantics<parallel>], iteration_bounds = array<i64: 2>, scalar_prefetch = 0 : i64, scratch_operands = 0 : i64, tpu.core_type = #tpu.core_type<tc>, window_params = [{pipeline_mode = #tpu.pipeline_mode<synchronous>, transform_indices = @transform_0, window_bounds = array<i64: 16, 112>}, {transform_indices = @transform_1, window_bounds = array<i64: 112, 512>}, {pipeline_mode = #tpu.pipeline_mode<synchronous>, transform_indices = @transform_2, window_bounds = array<i64: 16, 1>}, {transform_indices = @transform_3, window_bounds = array<i64: 16, 512>}]} {
    %c0 = arith.constant 0 : index
    %c0_0 = arith.constant 0 : index
    %0 = vector.load %arg1[%c0, %c0_0] : memref<16x112xbf16, #tpu.memory_space<vmem>>, vector<16x112xbf16>
    %c0_1 = arith.constant 0 : index
    %c0_2 = arith.constant 0 : index
    %1 = vector.load %arg2[%c0_1, %c0_2] : memref<112x512xbf16, #tpu.memory_space<vmem>>, vector<112x512xbf16>
    %cst = arith.constant dense<0.000000e+00> : vector<16x512xf32>
    %2 = tpu.matmul %0, %1, %cst {dimension_numbers = #tpu.dot_dimension_numbers<[1], [0], [0], [1], [0, 0, 1, 1], [], []>} : vector<16x112xbf16>, vector<112x512xbf16>, vector<16x512xf32> -> vector<16x512xf32>
    %c0_3 = arith.constant 0 : index
    %c0_4 = arith.constant 0 : index
    %3 = vector.load %arg3[%c0_3, %c0_4] : memref<16x1xf32, #tpu.memory_space<vmem>>, vector<16x1xf32>
    %4 = vector.broadcast %3 : vector<16x1xf32> to vector<16x512xf32>
    %5 = arith.addf %2, %4 : vector<16x512xf32>
    %c0_5 = arith.constant 0 : index
    %c0_6 = arith.constant 0 : index
    %6 = vector.load %arg4[%c0_5, %c0_6] : memref<16x512xf32, #tpu.memory_space<vmem>>, vector<16x512xf32>
    tpu.vector_store %arg4[%c0_5, %c0_6], %5 {strides = array<i32>} : memref<16x512xf32, #tpu.memory_space<vmem>>, vector<16x512xf32>,
    return
  }
  func.func @transform_0(%arg0: i32) -> (i32, i32) {
    %c0_i32 = arith.constant 0 : i32
    %c0_i32_0 = arith.constant 0 : i32
    %c0_i32_1 = arith.constant 0 : i32
    return %c0_i32, %c0_i32_0 : i32, i32
  }
  func.func @transform_1(%arg0: i32) -> (i32, i32) {
    %c0_i32 = arith.constant 0 : i32
    %c0_i32_0 = arith.constant 0 : i32
    return %c0_i32, %arg0 : i32, i32
  }
  func.func @transform_2(%arg0: i32) -> (i32, i32) {
    %c0_i32 = arith.constant 0 : i32
    %c0_i32_0 = arith.constant 0 : i32
    %c0_i32_1 = arith.constant 0 : i32
    return %c0_i32, %c0_i32_0 : i32, i32
  }
  func.func @transform_3(%arg0: i32) -> (i32, i32) {
    %c0_i32 = arith.constant 0 : i32
    %c0_i32_0 = arith.constant 0 : i32
    return %c0_i32, %arg0 : i32, i32
  }
}

</mosaic_0001>

<bundles_post_ra>
// kernel: tpu_custom_call.1
= control target key start
LH: loop header
LB: loop body
LE: loop exit
PB: predicated region body
PF: predicated region fallthrough
CT: control target
= control target key end

     0   :  { %8 = vsyncpa [#allocation3], 0  ;;  %s1033_s0 = inlined_call_operand.vmem [shape: bf16[16,112], index: 0, kind: input, shape index: {}]   ;;  %s1034_s1 = inlined_call_operand.hbm [shape: bf16[112,1024], index: 1, kind: input, shape index: {}]   ;;  %s1035_s2 = inlined_call_operand.vmem [shape: f32[16,1], index: 2, kind: input, shape index: {}]   ;;  %s1036_s3 = inlined_call_operand.hbm [shape: f32[16,1024], index: 3, kind: output, shape index: {}]  }
   0x1   :  { %10 = vsyncpa [#allocation3 + $0x1], 0 }
   0x2   :  { %11 = vsyncpa [#allocation4], 0 }
   0x3   :  { %13 = vsyncpa [#allocation4 + $0x1], 0  ;;  %s835_s12 = smov 0   ;;  %s837_s13 = smov 0  }
   0x4   :  { %s839_s14 = smov 0   ;;  %s841_s15 = smov 0  }
   0x5 LB: > { %s856_s16 = sadd.s32 4294967295, %s804_s15   ;;  %s564_s17 = sadd.s32 4294967294, %s804_s15   ;;  %s804_s15 = sphi %s841_s15, %s1049_s15   ;;  %s800_s14 = sphi %s839_s14, %s1048_s14   ;;  %s796_s13 = sphi %s837_s13, %s1047_s13   ;;  %s792_s12 = sphi %s835_s12, %s1046_s12  }
   0x6   : > { %s860_s18 = sadd.s32 1, %s804_s15   ;;  %s47_s19 = sadd.s32 1, %s800_s14 }
   0x7   : > { %s44_s20 = ssub.s32 %s804_s15, %s860_s18  ;;  %p54_p0 = scmp.ne.s32.totalorder %s800_s14, %s796_s13 }
   0x8   : > { %p45_p1 = scmp.eq.s32.totalorder %s44_s20, 0  ;;  %p55_p2 = scmp.eq.s32.totalorder %s804_s15, 0 }
   0x9   : > { %p60_p3 = scmp.ne.s32.totalorder %s796_s13, %s792_s12  ;;  %p61_p4 = scmp.eq.s32.totalorder %s856_s16, 0 }
   0xa   : > { %s872_s21 = scalar_select %p45_p1, %s800_s14, %s47_s19  }
   0xb   : > { %p56_p5 = por %p55_p2, %p54_p0  ;;  %p874_p6 = por %p61_p4, %p60_p3 }
   0xc   : > { %p105_p7 = scmp.eq.s32.totalorder %s856_s16, 1  ;;  %p111_p8 = scmp.eq.s32.totalorder %s564_s17, 1 }
   0xd   : > { %p623_p10 = scmp.lt.s32.totalorder %s804_s15, 2  ;;  %s137_s25 = sand.u32 1, %s800_s14  }
   0xe   : > { %p881_p11 = por %p105_p7, %p54_p0  ;;  %p885_p12 = por %p111_p8, %p60_p3 }
   0xf   : > { %s607_s26 = sshll.u32 %s804_s15, 8  ;;  %s609_s27 = smul.u32 224, %s137_s25 }
  0x10   : > { %s1039_s23 = scalar_select %p881_p11, 1, 0 }
  0x11   : > { %s1040_s24 = scalar_select %p885_p12, 1, 0 }
  0x12   : > { %s894_s30 = scalar_lea.hbm %s1034_s1, %s607_s26  ;;  %p896_p13 = pnand %p623_p10, %p56_p5 }
  0x13   : > { %s141_s5 = scalar_lea.vmem [#allocation2], %s609_s27  ;;  %s903_s7 = scalar_lea.sflag [#allocation3], %s137_s25 }
  0x14   : > { %s148_s6 = sshll.u32 %s141_s5, 4  ;;  %s708_s8 = scalar_lea.hbm %s894_s30, 3584  ;;  %s900_s6 = int_to_ptr.vmem [resolvable:$true] %s148_s6 }
  0x15   : > { %p709_p1 = scmp.ne.s32.totalorder %s894_s30, %s708_s8  ;;  %p710_p2 = pneg %p896_p13 }
  0x16   : > { %s713_s11 = scalar_lea.hbm %s1034_s1, 7168  ;;  %p714_p5 = scmp.lt.u32.totalorder %s894_s30, %s1034_s1 }
  0x17   : > { %p711_p3 = pnand %p710_p2, %p709_p1  ;;  %p715_p7 = scmp.lt.u32.totalorder %s713_s11, %s708_s8 }
  0x18   : > { %p717_p10 = scmp.lt.u32.totalorder %s708_s8, %s894_s30 }
  0x19   : > { %p712_p4 = pneg %p711_p3  ;;  %p716_p8 = por %p715_p7, %p714_p5 }
  0x1b   : > { %p718_p9 = por %p717_p10, %p716_p8 }
  0x1d   : > { %p719_p0 = pnand %p718_p9, %p712_p4 }
  0x1f   : > { %722 = shalt.err (!%p719_p0)
}
  0x20   : > { %s723_s20 = scalar_lea.vmem %s900_s6, 3584  ;;  %s806_s25 = smov [#allocation2]  }
  0x21   : > { %p724_p1 = scmp.ne.s32.totalorder %s900_s6, %s723_s20  ;;  %s728_s26 = sshll.u32 %s806_s25, 4  ;;  %s729_s26 = int_to_ptr.vmem [resolvable:$false] %s728_s26 }
  0x22   : > { %s730_s27 = scalar_lea.vmem %s729_s26, 7168  ;;  %p731_p11 = scmp.lt.s32.totalorder %s900_s6, %s729_s26 }
  0x23   : > { %p726_p3 = pnand %p724_p1, %p710_p2  ;;  %p732_p5 = scmp.lt.s32.totalorder %s730_s27, %s723_s20 }
  0x25   : > { %p727_p12 = pneg %p726_p3  ;;  %p733_p7 = por %p732_p5, %p731_p11 }
  0x27   : > { %p734_p8 = pnand %p733_p7, %p727_p12 }
  0x29   : > { %737 = shalt.err (!%p734_p8)
}
  0x2a   : > { %s807_s28 = smov 512   ;;  %s808_s29 = smov 256  }
  0x2b   : > { %s809_s5 = smov 16   ;;  %p156_p9 = scmp.lt.s32.totalorder %s804_s15, 3 }
  0x2c   : > { %618 = dma.hbm_to_vmem [thread:$0]  (!%p896_p13), %s894_s30, 3584, %s900_s6, %s903_s7, %s807_s28, %s808_s29, %s809_s5  }
  0x2d   : > { %p1042_p0 = scmp.ge.s32.totalorder %s804_s15, 1 }
  0x2f   : > { %p157_p2 = pnand %p1042_p0, %p156_p9 }
  0x30   : > { %s935_s8 = sand.u32 (!%p157_p2), 1, %s796_s13  }
  0x31   : > { %160 = sbr.rel (%p157_p2) target bundleno = 321 (0x141), region = 32  ;;  %s163_s10 = scalar_lea.sflag (!%p157_p2), [#allocation3], %s935_s8 }
  0x32   : > { %s610_s9 = smul.u32 (!%p157_p2), 224, %s935_s8 }
  0x34   : > { %s939_s11 = scalar_lea.vmem (!%p157_p2), [#allocation2], %s610_s9 }
  0x38   : > { %783 = dma.done.wait (%p874_p6), %s163_s10, 3584  }
  0x39   : > { %785 = vsyncadd (%p874_p6), %s163_s10, 4294963712  ;;  %v810_v0 = vmov 0   ;;  %v665_v1 = vld [vmem:[%s939_s11 + $0x4] ss:$16 sps:$4 sm:$0xff]   ;;  %v667_v2 = vld [vmem:[%s939_s11 + $0xc] ss:$16 sps:$4 sm:$0xff]  }
  0x3a   : > { %415 = vmatprep.mubr.bf16.mxu0 %v810_v0  ;;  %458 = vmatprep.mubr.bf16.mxu1 %v810_v0  ;;  %v669_v3 = vld [vmem:[%s939_s11] ss:$16 sps:$4 sm:$0xff]   ;;  %v670_v4 = vld [vmem:[%s939_s11 + $0x8] ss:$16 sps:$4 sm:$0xff]   ;;  %v671_v5 = vld [vmem:[%s939_s11 + $0x24] ss:$16 sps:$4 sm:$0xff]  }
  0x3b   : > { %664 = vset.pattern.permute.xlu0 %v810_v0  ;;  %383 = vmatprep.subr.bf16.mxu0 %v665_v1  ;;  %v673_v6 = vld [vmem:[%s939_s11 + $0x2c] ss:$16 sps:$4 sm:$0xff]   ;;  %v675_v7 = vld [vmem:[%s939_s11 + $0x20] ss:$16 sps:$4 sm:$0xff]   ;;  %v676_v8 = vld [vmem:[%s939_s11 + $0x28] ss:$16 sps:$4 sm:$0xff]  }
  0x3c   : > { %426 = vmatprep.subr.bf16.mxu1 %v667_v2  ;;  %384 = vmatpush1.bf16.msra.mxu0 %v669_v3  ;;  %v677_v9 = vld [vmem:[%s939_s11 + $0x44] ss:$16 sps:$4 sm:$0xff]   ;;  %v679_v10 = vld [vmem:[%s939_s11 + $0x4c] ss:$16 sps:$4 sm:$0xff]   ;;  %v681_v11 = vld [vmem:[%s939_s11 + $0x40] ss:$16 sps:$4 sm:$0xff]  }
  0x3d   : > { %427 = vmatpush1.bf16.msra.mxu1 %v670_v4  ;;  %385 = vmatprep.subr.bf16.mxu0 %v671_v5  ;;  %v682_v12 = vld [vmem:[%s939_s11 + $0x48] ss:$16 sps:$4 sm:$0xff]   ;;  %v683_v13 = vld [vmem:[%s939_s11 + $0x64] ss:$16 sps:$4 sm:$0xff]   ;;  %v685_v14 = vld [vmem:[%s939_s11 + $0x6c] ss:$16 sps:$4 sm:$0xff]  }
  0x3e   : > { %428 = vmatprep.subr.bf16.mxu1 %v673_v6  ;;  %v687_v15 = vld [vmem:[%s939_s11 + $0x60] ss:$16 sps:$4 sm:$0xff]   ;;  %v688_v16 = vld [vmem:[%s939_s11 + $0x68] ss:$16 sps:$4 sm:$0xff]   ;;  %v689_v17 = vld [vmem:[%s939_s11 + $0x84] ss:$16 sps:$4 sm:$0xff]  }
  0x3f   : > { %v691_v18 = vld [vmem:[%s939_s11 + $0x8c] ss:$16 sps:$4 sm:$0xff]   ;;  %v693_v19 = vld [vmem:[%s939_s11 + $0x80] ss:$16 sps:$4 sm:$0xff]   ;;  %v694_v20 = vld [vmem:[%s939_s11 + $0x88] ss:$16 sps:$4 sm:$0xff]  }
  0x40   : > { %386 = vmatpush1.bf16.msra.mxu0 %v675_v7  ;;  %v695_v21 = vld [vmem:[%s939_s11 + $0xa4] ss:$16 sps:$4 sm:$0xff]   ;;  %v697_v22 = vld [vmem:[%s939_s11 + $0xac] ss:$16 sps:$4 sm:$0xff]   ;;  %v699_v24 = vld [vmem:[%s939_s11 + $0xa0] ss:$16 sps:$4 sm:$0xff]  }
  0x41   : > { %429 = vmatpush1.bf16.msra.mxu1 %v676_v8  ;;  %387 = vmatprep.subr.bf16.mxu0 %v677_v9  ;;  %v222_v23 = vld [vmem:[%s1035_s2] sm:$0xff]  ;;  %v700_v25 = vld [vmem:[%s939_s11 + $0xa8] ss:$16 sps:$4 sm:$0xff]   ;;  %v703_v27 = vld [vmem:[%s939_s11 + $0xcc] ss:$16 sps:$4 sm:$0xff]   ;;  %vm379_vm0 = vcmask 916480  }
  0x42   : > { %430 = vmatprep.subr.bf16.mxu1 %v679_v10  ;;  %v701_v26 = vld [vmem:[%s939_s11 + $0xc4] ss:$16 sps:$4 sm:$0xff]   ;;  %226 = vperm.xlu0 %664, %v222_v23   ;;  %v223_v28 = vld [vmem:[%s1035_s2 + $0x8] sm:$0xff]  ;;  %v705_v29 = vld [vmem:[%s939_s11 + $0xc0] ss:$16 sps:$4 sm:$0xff]   ;;  %s570_s19 = sshll.u32 %s935_s8, 6 }
  0x43   : > { %v706_v30 = vld [vmem:[%s939_s11 + $0xc8] ss:$16 sps:$4 sm:$0xff]   ;;  %v707_v31 = vld [vmem:[%s1033_s0] sm:$0xff]   ;;  %s188_s20 = scalar_lea.vmem [#allocation5], %s570_s19  ;;  %s608_s26 = sshll.u32 %s856_s16, 9 }
  0x44   : > { %388 = vmatpush1.bf16.msra.mxu0 %v681_v11  ;;  %s491_s25 = sshll.u32 %s188_s20, 4  ;;  %s989_s28 = scalar_lea.hbm %s1036_s3, %s608_s26  ;;  %s984_s25 = int_to_ptr.vmem [resolvable:$true] %s491_s25 }
  0x45   : > { %431 = vmatpush1.bf16.msra.mxu1 %v682_v12  ;;  %389 = vmatprep.subr.bf16.mxu0 %v683_v13  ;;  %s478_s29 = scalar_lea.sflag [#allocation4], %s935_s8  ;;  %s738_s5 = scalar_lea.vmem %s984_s25, 1024 }
  0x46   : > { %432 = vmatprep.subr.bf16.mxu1 %v685_v14  ;;  %231 = vperm.xlu0 %664, %v223_v28   ;;  %p739_p6 = scmp.ne.s32.totalorder %s984_s25, %s738_s5  ;;  %p1043_p11 = scmp.ne.s32.totalorder %s1039_s23, 0 }
  0x47   : > { %s811_s9 = smov [#allocation5]  }
  0x48   : > { %390 = vmatpush1.bf16.msra.mxu0 %v687_v15  ;;  %p740_p12 = pnand %p739_p6, %p1043_p11  ;;  %s742_s10 = sshll.u32 %s811_s9, 4  ;;  %s743_s10 = int_to_ptr.vmem [resolvable:$false] %s742_s10 }
  0x49   : > { %433 = vmatpush1.bf16.msra.mxu1 %v688_v16  ;;  %391 = vmatprep.subr.bf16.mxu0 %v689_v17  ;;  %s744_s11 = scalar_lea.vmem %s743_s10, 2048  ;;  %p745_p4 = scmp.lt.s32.totalorder %s984_s25, %s743_s10 }
  0x4a   : > { %434 = vmatprep.subr.bf16.mxu1 %v691_v18  ;;  %p741_p13 = pneg %p740_p12  ;;  %p746_p10 = scmp.lt.s32.totalorder %s744_s11, %s738_s5 }
  0x4c   : > { %392 = vmatpush1.bf16.msra.mxu0 %v693_v19  ;;  %p747_p1 = por %p746_p10, %p745_p4 }
  0x4d   : > { %435 = vmatpush1.bf16.msra.mxu1 %v694_v20  ;;  %393 = vmatprep.subr.bf16.mxu0 %v695_v21 }
  0x4e   : > { %436 = vmatprep.subr.bf16.mxu1 %v697_v22  ;;  %p748_p3 = pnand %p747_p1, %p741_p13 }
  0x50   : > { %394 = vmatpush1.bf16.msra.mxu0 %v699_v24 }
  0x51   : > { %437 = vmatpush1.bf16.msra.mxu1 %v700_v25  ;;  %395 = vmatprep.subr.bf16.mxu0 %v701_v26 }
  0x52   : > { %438 = vmatprep.subr.bf16.mxu1 %v703_v27 }
  0x54   : > { %396 = vmatpush1.bf16.msra.mxu0 %v705_v29 }
  0x55   : > { %439 = vmatpush1.bf16.msra.mxu1 %v706_v30 }
  0x57   : > { %600 = vmatmul.mubr.msk.bf16.vlgmr.msra.gmra.mrb[0].mxu0 %vm379_vm0, %v707_v31 }
  0x58   : > { %601 = vmatmul.mubr.msk.bf16.vlgmr.msra.gmra.mrb[0].mxu1 %vm379_vm0, %v707_v31 }
  0xc1   : > { %v227_v32 = vpop.permute.xlu0 %226 }
  0xc5   : > { %v232_v33 = vpop.permute.xlu0 %231 }
 0x12a   : > { %v417_v34 = vpop.f32.mrb[0].mxu0 }
 0x12b   : > { %v460_v35 = vpop.f32.mrb[0].mxu1  ;;  %v418_v36 = vadd.f32 %v417_v34, %v227_v32  ;;  %v419_v38 = vpop.f32.mrb[1].mxu0 }
 0x12c   : > { %v461_v37 = vadd.f32 %v460_v35, %v227_v32  ;;  %v462_v39 = vpop.f32.mrb[1].mxu1  ;;  %v420_v40 = vadd.f32 %v419_v38, %v227_v32  ;;  %v421_v42 = vpop.f32.mrb[2].mxu0 }
 0x12d   : > { %v463_v41 = vadd.f32 %v462_v39, %v227_v32  ;;  %v464_v43 = vpop.f32.mrb[2].mxu1  ;;  %469 = vst [vmem:[%s188_s20] sm:$0xff] %v418_v36  ;;  %v422_v44 = vadd.f32 %v421_v42, %v232_v33  ;;  %v423_v46 = vpop.f32.mrb[3].mxu0 }
 0x12e   : > { %471 = vst [vmem:[%s188_s20 + $0x10] sm:$0xff] %v461_v37  ;;  %v465_v45 = vadd.f32 %v464_v43, %v232_v33  ;;  %v466_v47 = vpop.f32.mrb[3].mxu1  ;;  %470 = vst [vmem:[%s188_s20 + $0x8] sm:$0xff] %v420_v40  ;;  %v424_v48 = vadd.f32 %v423_v46, %v232_v33 }
 0x12f   : > { %472 = vst [vmem:[%s188_s20 + $0x18] sm:$0xff] %v463_v41  ;;  %v467_v49 = vadd.f32 %v466_v47, %v232_v33  ;;  %473 = vst [vmem:[%s188_s20 + $0x20] sm:$0xff] %v422_v44 }
 0x130   : > { %475 = vst [vmem:[%s188_s20 + $0x30] sm:$0xff] %v465_v45  ;;  %474 = vst [vmem:[%s188_s20 + $0x28] sm:$0xff] %v424_v48 }
 0x131   : > { %476 = vst [vmem:[%s188_s20 + $0x38] sm:$0xff] %v467_v49 }
 0x132   : > { %751 = shalt.err (!%p748_p3)
}
 0x133   : > { %s752_s22 = scalar_lea.hbm %s989_s28, 1024  ;;  %s756_s6 = scalar_lea.hbm %s1036_s3, 2048 }
 0x134   : > { %p753_p5 = scmp.ne.s32.totalorder %s989_s28, %s752_s22  ;;  %p757_p9 = scmp.lt.u32.totalorder %s989_s28, %s1036_s3 }
 0x135   : > { %p758_p0 = scmp.lt.u32.totalorder %s756_s6, %s752_s22  ;;  %p760_p6 = scmp.lt.u32.totalorder %s752_s22, %s989_s28 }
 0x136   : > { %p754_p7 = pnand %p753_p5, %p1043_p11 }
 0x137   : > { %p759_p2 = por %p758_p0, %p757_p9 }
 0x138   : > { %p755_p8 = pneg %p754_p7 }
 0x139   : > { %p761_p12 = por %p760_p6, %p759_p2 }
 0x13b   : > { %p762_p13 = pnand %p761_p12, %p755_p8 }
 0x13d   : > { %765 = shalt.err (!%p762_p13)
}
 0x13e   : > { %s812_s19 = smov 512   ;;  %s813_s20 = smov 1024  }
 0x13f   : > { %s814_s26 = smov 32  }
 0x140   : > { %613 = dma.vmem_to_hbm [thread:$0]  (%p1043_p11), %s984_s25, 1024, %s989_s28, %s478_s29, %s812_s19, %s813_s20, %s814_s26  }
 0x141 PF: > { %s506_s16 = sand.u32 1, %s792_s12   ;;  %p1044_p4 = scmp.ne.s32.totalorder %s1040_s24, 0 }
 0x142   : > { %p1045_p10 = scmp.ge.s32.totalorder %s804_s15, 2  ;;  %s507_s27 = scalar_lea.sflag [#allocation4], %s506_s16 }
 0x144   : > { %p620_p1 = pnand %p1045_p10, %p1044_p4 }
 0x146   : > { %787 = dma.done.wait (!%p620_p1), %s507_s27, 1024  }
 0x147   : > { %789 = vsyncadd (!%p620_p1), %s507_s27, 4294966272  ;;  %p16_p3 = scmp.ge.s32.totalorder %s860_s18, 4   ;;  %s1046_s12 = smov %s796_s13 }
 0x148   : > { %s1047_s13 = smov %s800_s14  ;;  %s1048_s14 = smov %s872_s21 }
 0x149   : > { %s1049_s15 = smov %s860_s18  ;;  %18 = sbr.rel (!%p16_p3) target bundleno = 5 (0x5), region = 77 }
 0x150   :  { %512 = vsyncpa [#allocation3], 1 }
 0x151   :  { %514 = vsyncpa [#allocation3 + $0x1], 1 }
 0x152   :  { %515 = vsyncpa [#allocation4], 1 }
 0x153   :  { %517 = vsyncpa [#allocation4 + $0x1], 1 }

</bundles_post_ra>
